<compile_context>
chip_gen: v5e
topology: v5e:2x2
jax: 0.10.0
libtpu: 0.0.40
codegen_flags: <defaults>
</compile_context>

<pallas_src>
import functools

import numpy as np
import jax
import jax.numpy as jnp
from jax import lax
from jax.experimental import pallas as pl
from jax.experimental.pallas import tpu as pltpu

_VMEM_LIMIT = 64 * 1024 * 1024          # <= physical VMEM on v5e/v6e/v7x
_BLOCK_TARGET_BYTES = 2 << 20           # ~2 MiB blocks: long DMA bursts


def _round_tile_rows(tb, B):
    """Clamp a batch-tile to B (full extent) or a multiple of 8."""
    if tb >= B:
        return B
    return max(8, (tb // 8) * 8)


# ---------------------------------------------------------------------------
# Path 1: chunk-structured permutation -> pure DMA gather (no compute).
# ---------------------------------------------------------------------------
def _chunk_copy_kernel(chunk_ids_ref, x_ref, o_ref):
    # chunk_ids_ref lives in SMEM (scalar prefetch) and is only consumed by the
    # index_maps; the body is a straight VMEM tile copy.
    del chunk_ids_ref
    o_ref[...] = x_ref[...]


def _permute_chunk_gather(x, chunk_ids, chunk_size):
    B, F = x.shape
    n_chunks = F // chunk_size
    itemsize = jnp.dtype(x.dtype).itemsize
    # Batch tile sized so one (tb, chunk_size) block is ~2 MiB (bounded VMEM,
    # amortized per-step overhead, near-roofline DMA).
    tb = min(1024, max(8, (_BLOCK_TARGET_BYTES // itemsize) // chunk_size))
    tb = _round_tile_rows(tb, B)
    grid = (pl.cdiv(B, tb), n_chunks)
    return pl.pallas_call(
        _chunk_copy_kernel,
        out_shape=jax.ShapeDtypeStruct((B, F), x.dtype),
        grid_spec=pltpu.PrefetchScalarGridSpec(
            num_scalar_prefetch=1,
            grid=grid,
            in_specs=[
                # gather: input block column index is data-dependent (SMEM table)
                pl.BlockSpec((tb, chunk_size), lambda b, j, ids: (b, ids[j])),
            ],
            out_specs=pl.BlockSpec((tb, chunk_size), lambda b, j, ids: (b, j)),
        ),
        compiler_params=pltpu.CompilerParams(
            # Both axes are independent gathers -> shard across v7x's 2 TCs.
            dimension_semantics=("parallel", "parallel"),
            vmem_limit_bytes=_VMEM_LIMIT),
        cost_estimate=pl.CostEstimate(
            flops=0, transcendentals=0, bytes_accessed=2 * B * F * itemsize),
    )(jnp.asarray(chunk_ids, dtype=jnp.int32), x)


# ---------------------------------------------------------------------------
# Path 2: cyclic shift -> pltpu.roll (XLU), one pass over the data.
# ---------------------------------------------------------------------------
def _roll_kernel(x_ref, o_ref, *, shift):
    o_ref[...] = pltpu.roll(x_ref[...], shift=shift, axis=1)


def _permute_roll(x, shift):
    B, F = x.shape
    itemsize = jnp.dtype(x.dtype).itemsize
    # in + out, each double-buffered: 4 * tb * F * itemsize <= budget.
    budget = 16 << 20
    tb = max(8, budget // (4 * F * itemsize))
    tb = _round_tile_rows(tb, B)
    # TODO(synk): for very large F (or B <= tb) decompose the roll into two
    # contiguous column-segment copies so the F axis can be tiled / sharded.
    return pl.pallas_call(
        functools.partial(_roll_kernel, shift=shift),
        out_shape=jax.ShapeDtypeStruct((B, F), x.dtype),
        grid=(pl.cdiv(B, tb),),
        in_specs=[pl.BlockSpec((tb, F), lambda b: (b, 0))],
        out_specs=pl.BlockSpec((tb, F), lambda b: (b, 0)),
        compiler_params=pltpu.CompilerParams(
            dimension_semantics=("parallel",),
            vmem_limit_bytes=_VMEM_LIMIT),
        cost_estimate=pl.CostEstimate(
            flops=0, transcendentals=0, bytes_accessed=2 * B * F * itemsize),
    )(x)


# ---------------------------------------------------------------------------
# Path 3: general permutation -> K-tiled one-hot matmul fallback (MXU).
# Grid = (batch tiles, output-column tiles, K tiles over F); the f32
# accumulator lives in VMEM scratch and K is the innermost "arbitrary" axis,
# so VMEM stays bounded for arbitrary F.  The (tk, tn) iota is a
# grid-invariant input (resident in VMEM, fetched once).
# ---------------------------------------------------------------------------
def _onehot_matmul_kernel(perm_ref, iota_ref, x_ref, o_ref, acc_ref, *,
                          precision):
    k = pl.program_id(2)
    tk = x_ref.shape[1]

    @pl.when(k == 0)
    def _():
        acc_ref[...] = jnp.zeros_like(acc_ref)

    # Source indices relative to this K tile: onehot[i, t] = (k*tk + i == perm[t])
    rel = perm_ref[...] - k * tk                              # (1, tn) int32
    oh_dtype = jnp.bfloat16 if x_ref.dtype == jnp.bfloat16 else jnp.float32
    onehot = (iota_ref[...] == rel).astype(oh_dtype)          # (tk, tn)
    acc_ref[...] += jnp.dot(x_ref[...], onehot,
                            preferred_element_type=jnp.float32,
                            precision=precision)

    @pl.when(k == pl.num_programs(2) - 1)
    def _():
        o_ref[...] = acc_ref[...].astype(o_ref.dtype)


def _pick_col_tile(F):
    for t in (512, 256, 128):
        if F % t == 0:
            return t
    # Irregular F: small F handled un-tiled; large F uses masked partial tiles
    # (padded perm/x regions produce zero one-hot rows / masked writes).
    return F if F <= 1024 else 128


def _permute_matmul(x, permute):
    B, F = x.shape
    itemsize = jnp.dtype(x.dtype).itemsize
    perm2d = jnp.asarray(permute, dtype=jnp.int32).reshape(1, F)
    tn = _pick_col_tile(F)
    tk = tn
    tb = B if B <= 256 else 256
    # Grid-invariant row-index iota for the one-hot compare (built once here,
    # stays resident in VMEM because its block index never changes).
    iota = lax.broadcasted_iota(jnp.int32, (tk, tn), 0)
    precision = lax.Precision.HIGHEST if x.dtype == jnp.float32 else None
    grid = (pl.cdiv(B, tb), pl.cdiv(F, tn), pl.cdiv(F, tk))
    return pl.pallas_call(
        functools.partial(_onehot_matmul_kernel, precision=precision),
        out_shape=jax.ShapeDtypeStruct((B, F), x.dtype),
        grid=grid,
        in_specs=[
            pl.BlockSpec((1, tn), lambda i, j, k: (0, j)),    # perm slice
            pl.BlockSpec((tk, tn), lambda i, j, k: (0, 0)),   # resident iota
            pl.BlockSpec((tb, tk), lambda i, j, k: (i, k)),   # x tile
        ],
        out_specs=pl.BlockSpec((tb, tn), lambda i, j, k: (i, j)),
        scratch_shapes=[pltpu.VMEM((tb, tn), jnp.float32)],
        compiler_params=pltpu.CompilerParams(
            dimension_semantics=("parallel", "parallel", "arbitrary"),
            vmem_limit_bytes=_VMEM_LIMIT),
        cost_estimate=pl.CostEstimate(
            flops=2 * B * F * F, transcendentals=0,
            bytes_accessed=2 * B * F * itemsize + F * 4 + tk * tn * 4),
    )(perm2d, iota, x)


# ---------------------------------------------------------------------------
# Plan selection (host-side, on the static permutation buffer).
# ---------------------------------------------------------------------------
def _check_chunk_structure(p, c):
    F = p.shape[0]
    blocks = p.reshape(F // c, c)
    starts = blocks[:, 0]
    if np.any(starts % c != 0):
        return None
    expect = starts[:, None] + np.arange(c)[None, :]
    if not np.array_equal(blocks, expect):
        return None
    return (starts // c).astype(np.int32)


def _plan_permutation(permute):
    # NOTE: runs eagerly on the concrete buffer (it is fixed at module init).
    p = np.asarray(permute).astype(np.int64)
    F = p.shape[0]
    ar = np.arange(F)
    # 1) chunk structure at 128-lane-aligned granularity, largest chunk first
    #    (larger chunks -> fewer grid steps, longer DMA bursts; the batch tile
    #    is shrunk by the wrapper so blocks stay ~2 MiB).
    max_c = min(F, 8192)
    for c in sorted((c for c in range(128, max_c + 1, 128) if F % c == 0),
                    reverse=True):
        ids = _check_chunk_structure(p, c)
        if ids is not None:
            return ("chunk", c, ids)
    # 2) pure cyclic shift: permute[j] = (j - shift) mod F
    shift = int((-int(p[0])) % F)
    if np.array_equal(p, (ar - shift) % F):
        return ("roll", shift)
    # 3) fully general
    return ("general", p)


def permute_in(x, permute):
    """Pallas equivalent of PermuteIn.forward: x[:, permute]."""
    plan = _plan_permutation(permute)
    if plan[0] == "chunk":
        _, chunk_size, chunk_ids = plan
        return _permute_chunk_gather(x, chunk_ids, chunk_size)
    if plan[0] == "roll":
        return _permute_roll(x, plan[1])
    return _permute_matmul(x, permute)


# ---------------------------------------------------------------------------
# Deterministic re-implementation of PermuteIn.__init__'s buffer.
# ---------------------------------------------------------------------------
def make_permute_indices(key, full_dim, heads, mode="chunk_random",
                         roll=0.4, chunks=4):
    dim = full_dim // heads
    roll_n = int(roll * full_dim)
    if mode == "random":
        permute = jax.random.permutation(key, full_dim)
    elif mode == "roll":
        permute = jnp.roll(jnp.arange(full_dim), roll_n)
    elif mode == "chunk_random":
        assert dim % chunks == 0, "chunks must divide the dim evenly"
        chunk_size = dim // chunks
        n_chunks_total = full_dim // chunk_size
        chunk_indices = jax.random.permutation(key, n_chunks_total)
        permute = jnp.concatenate(
            [jnp.arange(chunk_size) + i * chunk_size for i in chunk_indices])
    else:
        raise NotImplementedError("mode not implemented")
    return permute.astype(jnp.int32)


if __name__ == "__main__":
    key = jax.random.PRNGKey(0)
    k_perm, k_rand, k_x = jax.random.split(key, 3)

    # Small shapes consistent with the module; chunk_size = dim//chunks = 128
    # so mode='chunk_random' exercises the DMA-gather fast path.
    batch, full_dim, heads, chunks = 8, 512, 2, 2

    x = jax.random.normal(k_x, (batch, full_dim), dtype=jnp.float32)

    # 1) chunk_random -> scalar-prefetch DMA gather path (exact copy).
    p_chunk = make_permute_indices(k_perm, full_dim, heads,
                                   mode="chunk_random", chunks=chunks)
    out_chunk = jax.block_until_ready(permute_in(x, p_chunk))
    assert out_chunk.shape == x.shape and out_chunk.dtype == x.dtype
    assert jnp.array_equal(out_chunk, x[:, p_chunk]), "chunk path mismatch"

    # 2) roll -> pltpu.roll path (shift=204, not 128-aligned; exact copy).
    p_roll = make_permute_indices(k_perm, full_dim, heads, mode="roll", roll=0.4)
    out_roll = jax.block_until_ready(permute_in(x, p_roll))
    assert jnp.array_equal(out_roll, x[:, p_roll]), "roll path mismatch"

    # 3) random -> K-tiled one-hot matmul fallback.  With Precision.HIGHEST
    #    the f32 selection is exact to f32 rounding; tolerance kept with a
    #    margin (a wrong permutation would be O(1) off, far above tol).
    p_rand = make_permute_indices(k_rand, full_dim, heads, mode="random")
    out_rand = jax.block_until_ready(permute_in(x, p_rand))
    assert jnp.allclose(out_rand, x[:, p_rand], rtol=5e-3, atol=5e-3), \
        "random path mismatch"

    print("KERNEL_OK")
</pallas_src>

<mosaic_0001>
module attributes {stable_mosaic.version = 11 : i64} {
  func.func @_chunk_copy_kernel(%arg0: i32, %arg1: i32, %arg2: memref<4xi32, #tpu.memory_space<smem>>, %arg3: memref<8x128xf32, #tpu.memory_space<vmem>>, %arg4: memref<8x128xf32, #tpu.memory_space<vmem>>) attributes {dimension_semantics = [#tpu.dimension_semantics<parallel>, #tpu.dimension_semantics<parallel>], iteration_bounds = array<i64: 1, 4>, scalar_prefetch = 1 : i64, scratch_operands = 0 : i64, tpu.core_type = #tpu.core_type<tc>, window_params = [{transform_indices = @transform_0, window_bounds = array<i64: 8, 128>}, {transform_indices = @transform_1, window_bounds = array<i64: 8, 128>}]} {
    %c0 = arith.constant 0 : index
    %c0_0 = arith.constant 0 : index
    %0 = vector.load %arg3[%c0, %c0_0] : memref<8x128xf32, #tpu.memory_space<vmem>>, vector<8x128xf32>
    %c0_1 = arith.constant 0 : index
    %c0_2 = arith.constant 0 : index
    %1 = vector.load %arg4[%c0_1, %c0_2] : memref<8x128xf32, #tpu.memory_space<vmem>>, vector<8x128xf32>
    tpu.vector_store %arg4[%c0_1, %c0_2], %0 {strides = array<i32>} : memref<8x128xf32, #tpu.memory_space<vmem>>, vector<8x128xf32>,
    return
  }
  func.func @transform_0(%arg0: i32, %arg1: i32, %arg2: memref<4xi32, #tpu.memory_space<smem>>) -> (i32, i32) {
    %0 = arith.index_cast %arg1 : i32 to index
    %1 = memref.load %arg2[%0] : memref<4xi32, #tpu.memory_space<smem>>
    %c0_i32 = arith.constant 0 : i32
    return %arg0, %1 : i32, i32
  }
  func.func @transform_1(%arg0: i32, %arg1: i32, %arg2: memref<4xi32, #tpu.memory_space<smem>>) -> (i32, i32) {
    %c0_i32 = arith.constant 0 : i32
    return %arg0, %arg1 : i32, i32
  }
}

</mosaic_0001>

<bundles_post_ra>
// kernel: tpu_custom_call.1
= control target key start
LH: loop header
LB: loop body
LE: loop exit
PB: predicated region body
PF: predicated region fallthrough
CT: control target
= control target key end

     0   :  { %s523_s12 = smov [#allocation3]   ;;  %s711_s0 = inlined_call_operand.hbm [shape: s32[4], index: 0, kind: input, shape index: {}]   ;;  %s712_s1 = inlined_call_operand.hbm [shape: f32[8,512], index: 1, kind: input, shape index: {}]   ;;  %s713_s2 = inlined_call_operand.hbm [shape: f32[8,512], index: 2, kind: output, shape index: {}]  }
   0x1   :  { %s8_s11 = sshll.u32 %s711_s0, 4  ;;  %s9_s11 = int_to_ptr.hbm [resolvable:$true] %s8_s11 }
   0x2   :  { %11 = dma.hbm_to_smem %s9_s11, 16, %s523_s12, [#allocation2] }
   0x3   :  { %477 = dma.done.wait [#allocation2], 16 }
   0x4   :  { %478 = vsyncadd [#allocation2], 4294967280 }
   0x5   :  { %14 = sfence }
   0x6   :  { %15 = vsyncpa [#allocation5], 0 }
   0x7   :  { %17 = vsyncpa [#allocation5 + $0x1], 0 }
   0x8   :  { %18 = vsyncpa [#allocation6], 0 }
   0x9   :  { %20 = vsyncpa [#allocation6 + $0x1], 0  ;;  %s542_s13 = smov 0   ;;  %s544_s14 = smov 0  }
   0xa   :  { %s546_s15 = smov 0   ;;  %s548_s16 = smov 0  }
   0xb   :  { %s550_s17 = smov 0   ;;  %s552_s0 = smov 0  }
   0xc   :  { %s554_s18 = smov 0   ;;  %s556_s19 = smov 0  }
   0xd   :  { %s558_s20 = smov 0  }
   0xe LB: > { %716 = sst [smem:[#allocation13_spill]] %s517_s19  ;;  %s267_s21 = sadd.s32 4294967295, %s521_s20   ;;  %s521_s20 = sphi %s558_s20, %s26_s20   ;;  %s517_s19 = sphi %s556_s19, %s725_s19   ;;  %s513_s18 = sphi %s554_s18, %s724_s18   ;;  %s509_s0 = sphi %s552_s0, %s731_s0   ;;  %s505_s17 = sphi %s550_s17, %s730_s17   ;;  %s501_s16 = sphi %s548_s16, %s729_s16   ;;  %s497_s15 = sphi %s546_s15, %s728_s15   ;;  %s493_s14 = sphi %s544_s14, %s727_s14   ;;  %s489_s13 = sphi %s542_s13, %s726_s13  }
   0xf   : > { %s268_s22 = sadd.s32 4294967294, %s521_s20   ;;  %s35_s23 = sadd.s32 1, %s517_s19 }
  0x10   : > { %s42_s24 = sld [smem:[#allocation3 + %s517_s19]]  ;;  %p36_p0 = scmp.ge.s32.totalorder %s35_s23, 4 }
  0x11   : > { %s49_s25 = sadd.s32 1, %s509_s0  ;;  %p56_p1 = scmp.ne.s32.totalorder %s509_s0, %s505_s17 }
  0x12   : > { %p57_p2 = scmp.eq.s32.totalorder %s521_s20, 0  ;;  %s733_s23 = smov (%p36_p0, %s35_s23), 0 }
  0x13   : > { %717 = sst [smem:[#allocation14_spill]] %s733_s23  ;;  %p62_p4 = scmp.ne.s32.totalorder %s505_s17, %s501_s16 }
  0x14   : > { %p595_p3 = por %p57_p2, %p56_p1  ;;  %s43_s27 = sld [smem:[#allocation3 + %s733_s23]] }
  0x15   : > { %p63_p5 = scmp.eq.s32.totalorder %s267_s21, 0  ;;  %s73_s28 = ssub.s32 %s517_s19, %s733_s23 }
  0x16   : > { %s77_s29 = sadd.s32 1, %s497_s15  ;;  %p75_p7 = scmp.eq.s32.totalorder %s73_s28, 0 }
  0x17   : > { %p604_p6 = por %p63_p5, %p62_p4  ;;  %p87_p8 = scmp.ne.s32.totalorder %s497_s15, %s493_s14 }
  0x18   : > { %p88_p9 = scmp.eq.s32.totalorder %s267_s21, 3  ;;  %p93_p11 = scmp.ne.s32.totalorder %s493_s14, %s489_s13 }
  0x19   : > { %s611_s3 = scalar_select %p75_p7, %s497_s15, %s77_s29  }
  0x1a   : > { %p613_p10 = por %p88_p9, %p87_p8  ;;  %s45_s5 = ssub.s32 %s42_s24, %s43_s27 }
  0x1b   : > { %p94_p12 = scmp.eq.s32.totalorder %s268_s22, 3  ;;  %p47_p13 = scmp.eq.s32.totalorder %s45_s5, 0 }
  0x1c   : > { %p296_p1 = scmp.lt.s32.totalorder %s521_s20, 4  ;;  %s114_s8 = sand.u32 1, %s509_s0  }
  0x1d   : > { %p619_p0 = por %p94_p12, %p93_p11  ;;  %s271_s10 = sshll.u32 %s114_s8, 3 }
  0x1e   : > { %s625_s7 = scalar_select %p47_p13, %s509_s0, %s49_s25  }
  0x1f   : > { %p630_p2 = pnand %p296_p1, %p595_p3  ;;  %p273_p4 = scmp.ge.s32.totalorder %s521_s20, 1 }
  0x20   : > { %s280_s11 = scalar_select %p595_p3, [#allocation3], [#allocation8] }
  0x21   : > { %s281_s12 = scalar_select %p595_p3, %s517_s19, 0 }
  0x22   : > { %s735_s11 = smov (!%p296_p1, %s280_s11), [#allocation9]  ;;  %p134_p5 = scmp.lt.s32.totalorder %s521_s20, 5 }
  0x23   : > { %s737_s12 = smov (!%p296_p1, %s281_s12), 0  ;;  %s118_s22 = scalar_lea.vmem [#allocation4], %s271_s10 }
  0x24   : > { %s119_s16 = sld [smem:[%s735_s11 + %s737_s12]]  ;;  %p641_p7 = pnand %p273_p4, %p134_p5 }
  0x25   : > { %s129_s24 = sshll.u32 %s118_s22, 4  ;;  %s115_s5 = scalar_lea.sflag [#allocation5], %s114_s8  ;;  %s130_s24 = int_to_ptr.vmem [resolvable:$true] %s129_s24 }
  0x26   : > { %p387_p8 = pneg %p630_p2  ;;  %s390_s12 = scalar_lea.hbm %s712_s1, 32 }
  0x2a   : > { %s272_s25 = sshll.u32 %s119_s16, 3 }
  0x2b   : > { %s125_s29 = scalar_lea.hbm %s712_s1, %s272_s25 }
  0x2c   : > { %s127_s26 = sshll.u32 %s125_s29, 4  ;;  %s128_s26 = int_to_ptr.hbm [resolvable:$true] %s127_s26 }
  0x2d   : > { %s383_s23 = sshra.s32 %s128_s26, 4  ;;  %s384_s23 = int_to_ptr.hbm [resolvable:$true] %s383_s23 }
  0x2e   : > { %s385_s19 = scalar_lea.hbm %s384_s23, 8  ;;  %p391_p12 = scmp.lt.s32.totalorder %s384_s23, %s712_s1 }
  0x2f   : > { %p386_p3 = scmp.ne.s32.totalorder %s384_s23, %s385_s19  ;;  %p392_p13 = scmp.lt.s32.totalorder %s390_s12, %s385_s19 }
  0x31   : > { %p388_p9 = pnand %p387_p8, %p386_p3  ;;  %p393_p1 = por %p392_p13, %p391_p12 }
  0x33   : > { %p389_p11 = pneg %p388_p9 }
  0x35   : > { %p394_p4 = pnand %p393_p1, %p389_p11 }
  0x37   : > { %397 = shalt.err (!%p394_p4)
}
  0x38   : > { %291 = dma.hbm_to_vmem [thread:$0]  (!%p630_p2), %s128_s26, 128, %s130_s24, %s115_s5  }
  0x39   : > { %138 = sbr.rel (%p641_p7) target bundleno = 79 (0x4f), region = 24  ;;  %s140_s8 = sand.u32 (!%p641_p7), 1, %s505_s17  }
  0x3a   : > { %s274_s25 = sshll.u32 (!%p641_p7), %s140_s8, 3  ;;  %s141_s27 = scalar_lea.sflag (!%p641_p7), [#allocation5], %s140_s8 }
  0x3b   : > { %s144_s28 = scalar_lea.vmem (!%p641_p7), [#allocation4], %s274_s25 }
  0x3e   : > { %480 = dma.done.wait (%p604_p6), %s141_s27, 128  }
  0x3f   : > { %482 = vsyncadd (%p604_p6), %s141_s27, 4294967168  ;;  %s161_s19 = sand.u32 1, %s493_s14   ;;  %s277_s23 = sshll.u32 %s513_s18, 3  ;;  %v165_v0 = vld [vmem:[%s144_s28] sm:$0xff] }
  0x40   : > { %s275_s9 = sshll.u32 %s161_s19, 3  ;;  %s180_s29 = scalar_lea.hbm %s713_s2, %s277_s23 }
  0x41   : > { %s163_s26 = scalar_lea.vmem [#allocation7], %s275_s9  ;;  %s184_s11 = sshll.u32 %s180_s29, 4  ;;  %s185_s11 = int_to_ptr.hbm [resolvable:$true] %s184_s11 }
  0x42   : > { %s182_s5 = sshll.u32 %s163_s26, 4  ;;  %166 = vst [vmem:[%s163_s26] sm:$0xff] %v165_v0  ;;  %s168_s10 = scalar_lea.sflag [#allocation6], %s161_s19  ;;  %s183_s5 = int_to_ptr.vmem [resolvable:$true] %s182_s5 }
  0x43   : > { %s427_s30 = sshra.s32 %s185_s11, 4  ;;  %s433_s22 = scalar_lea.hbm %s713_s2, 32  ;;  %s428_s30 = int_to_ptr.hbm [resolvable:$true] %s427_s30 }
  0x44   : > { %s429_s12 = scalar_lea.hbm %s428_s30, 8  ;;  %p434_p7 = scmp.lt.s32.totalorder %s428_s30, %s713_s2 }
  0x45   : > { %p430_p6 = scmp.ne.s32.totalorder %s428_s30, %s429_s12  ;;  %p435_p3 = scmp.lt.s32.totalorder %s433_s22, %s429_s12 }
  0x47   : > { %p431_p2 = pnand %p430_p6, %p613_p10  ;;  %p436_p8 = por %p435_p3, %p434_p7 }
  0x49   : > { %p432_p5 = pneg %p431_p2 }
  0x4b   : > { %p437_p9 = pnand %p436_p8, %p432_p5 }
  0x4d   : > { %440 = shalt.err (!%p437_p9)
}
  0x4e   : > { %284 = dma.vmem_to_hbm [thread:$0]  (%p613_p10), %s183_s5, 128, %s185_s11, %s168_s10  }
  0x4f PF: > { %p297_p11 = scmp.ge.s32.totalorder %s521_s20, 2  ;;  %s196_s27 = sand.u32 1, %s489_s13  }
  0x50   : > { %s197_s28 = scalar_lea.sflag [#allocation6], %s196_s27 }
  0x51   : > { %p293_p12 = pnand %p297_p11, %p619_p0 }
  0x53   : > { %p294_p13 = pneg %p293_p12 }
  0x55   : > { %484 = dma.done.wait (%p294_p13), %s197_s28, 128  }
  0x56   : > { %486 = vsyncadd (%p294_p13), %s197_s28, 4294967168  ;;  %s26_s20 = sadd.s32 1, %s521_s20   ;;  %s724_s18 = sld [smem:[#allocation13_spill]] }
  0x57   : > { %p23_p1 = scmp.ge.s32.totalorder %s26_s20, 6   ;;  %s725_s19 = sld [smem:[#allocation14_spill]] }
  0x58   : > { %s726_s13 = smov %s493_s14  ;;  %s727_s14 = smov %s497_s15 }
  0x59   : > { %s728_s15 = smov %s611_s3  ;;  %s729_s16 = smov %s505_s17 }
  0x5a   : > { %s730_s17 = smov %s509_s0  ;;  %s731_s0 = smov %s625_s7 }
  0x5b   :  { %25 = sbr.rel (!%p23_p1) target bundleno = 14 (0xe), region = 69 }
  0x60   :  { %203 = vsyncpa [#allocation5], 1 }
  0x61   :  { %205 = vsyncpa [#allocation5 + $0x1], 1 }
  0x62   :  { %206 = vsyncpa [#allocation6], 1 }
  0x63   :  { %208 = vsyncpa [#allocation6 + $0x1], 1 }

</bundles_post_ra>
